<compile_context>
chip_gen: v7x
topology: tpu7x:2x2x1
jax: 0.10.0
libtpu: 0.0.40
codegen_flags: <defaults>
</compile_context>

<pallas_src>
import jax
import jax.numpy as jnp
from jax.experimental import pallas as pl
from jax.experimental.pallas import tpu as pltpu


def _unembed_kernel(x_ref, o_ref):
    # x_ref: (T, C) block in VMEM ; o_ref: (C, T) block in VMEM.
    # Pure on-chip transpose (XLU); zero FLOPs, HBM-bandwidth bound.
    o_ref[...] = x_ref[...].T


def _round_up(x, m):
    return ((x + m - 1) // m) * m


def _round_down(x, m):
    return (x // m) * m


def _pick_tile_hw(B, HW, C, dtype):
    """Largest lane-aligned HW tile whose *padded* double-buffered blocks fit the
    VMEM budget, further capped so the grid has enough steps to pipeline and to
    split across v7x's two TensorCores."""
    itemsize = jnp.dtype(dtype).itemsize
    lane = 128
    sub = max(8, 32 // itemsize)          # sublane pack: 8 f32, 16 bf16, 32 i8

    # Padded bytes per unit of T for the double-buffered pipeline:
    #   input  block (T, C): T rows (T is a 128-multiple >= sub) x roundup(C, 128) lanes
    #   output block (C, T): roundup(C, sub) rows x T lanes
    per_t = 2 * (_round_up(C, lane) + _round_up(C, sub)) * itemsize
    budget = 16 << 20                      # pipeline-buffer budget; fits all generations
    t = max(lane, _round_down(budget // per_t, lane))
    t = min(t, 8192)

    # Pipeline-depth cap: aim for >= ~8 total grid steps (B * tiles), but never
    # shrink tiles below 512 (keeps strided output-DMA chunks >= 2-4 KiB).
    target_tiles = -(-8 // B)              # ceil(8 / B)
    t_cap = max(512, _round_down(HW // target_tiles, lane))
    t = min(t, t_cap)

    if t >= HW:
        return HW                          # full-extent block along HW is always legal
    return t


def patch_unembed(x, x_size, *, tile_hw=None):
    """x: (B, HW, C) array, x_size: (H, W) python ints. Returns (B, C, H, W)."""
    B, HW, C = x.shape
    H, W = int(x_size[0]), int(x_size[1])
    assert H * W == HW, "x_size must match the token count"

    T = tile_hw if tile_hw is not None else _pick_tile_hw(B, HW, C, x.dtype)
    T = min(int(T), HW)
    if T < HW:
        # Partial-extent blocks must satisfy the (8, 128) tiling constraint; a
        # multiple of 128 is required for the (C, T) output block's last dim
        # and keeps output stores lane-dense (unmasked vst).
        assert T % 128 == 0, "HW tile must be a multiple of 128 when it tiles HW"
    num_hw_tiles = pl.cdiv(HW, T)

    itemsize = jnp.dtype(x.dtype).itemsize
    cost = pl.CostEstimate(
        flops=0,
        transcendentals=0,
        bytes_accessed=2 * B * HW * C * itemsize,
    )

    out_chw = pl.pallas_call(
        _unembed_kernel,
        out_shape=jax.ShapeDtypeStruct((B, C, HW), x.dtype),
        grid_spec=pltpu.PrefetchScalarGridSpec(
            num_scalar_prefetch=0,
            grid=(B, num_hw_tiles),
            in_specs=[
                pl.BlockSpec((pl.Squeezed(), T, C), lambda b, t: (b, t, 0)),
            ],
            out_specs=pl.BlockSpec((pl.Squeezed(), C, T), lambda b, t: (b, 0, t)),
        ),
        compiler_params=pltpu.CompilerParams(
            dimension_semantics=("parallel", "parallel"),
            # 16 MiB of pipeline buffers + headroom; below v7x's 64 MiB physical
            # and well below v5e/v6e's 128 MiB physical VMEM.
            vmem_limit_bytes=32 << 20,
        ),
        cost_estimate=cost,
    )(x)

    # Contiguous reshape (the torch .view) — pure metadata, stays in JAX glue,
    # since the kernel already emitted C-major (B, C, HW) data.
    return out_chw.reshape(B, C, H, W)


def _reference(x, x_size):
    B, HW, C = x.shape
    return jnp.swapaxes(x, 1, 2).reshape(B, C, x_size[0], x_size[1])


if __name__ == "__main__":
    key = jax.random.PRNGKey(0)
    k1, k2, k3 = jax.random.split(key, 3)

    # Case 1: module-consistent shape (img_size=64, patch_size=4 -> 16x16 tokens,
    # embed_dim=64). Default tile picker -> single full-extent tile per batch.
    B, H, W, C = 2, 16, 16, 64
    HW = H * W
    x1 = jax.random.normal(k1, (B, HW, C), dtype=jnp.float32)
    out1 = jax.block_until_ready(patch_unembed(x1, (H, W)))
    ref1 = _reference(x1, (H, W))
    assert out1.shape == (B, C, H, W), out1.shape
    assert out1.dtype == x1.dtype, out1.dtype
    assert jnp.array_equal(out1, ref1), "mismatch vs reference (case 1)"

    # Case 2: forced tiling with a NON-divisible HW (400 = 256 + 144) in bf16 —
    # exercises the clipped partial-tile writeback path.
    B2, H2, W2, C2 = 2, 20, 20, 32
    HW2 = H2 * W2
    x2 = jax.random.normal(k2, (B2, HW2, C2), dtype=jnp.bfloat16)
    out2 = jax.block_until_ready(patch_unembed(x2, (H2, W2), tile_hw=256))
    ref2 = _reference(x2, (H2, W2))
    assert out2.shape == (B2, C2, H2, W2), out2.shape
    assert out2.dtype == x2.dtype, out2.dtype
    assert jnp.array_equal(out2, ref2), "mismatch vs reference (case 2)"

    # Case 3: default tile picker multi-tile path with a partial last tile
    # (B=1, HW=2304 -> T=512 -> 4 full tiles + one 256-row remainder).
    B3, H3, W3, C3 = 1, 48, 48, 64
    HW3 = H3 * W3
    x3 = jax.random.normal(k3, (B3, HW3, C3), dtype=jnp.float32)
    out3 = jax.block_until_ready(patch_unembed(x3, (H3, W3)))
    ref3 = _reference(x3, (H3, W3))
    assert out3.shape == (B3, C3, H3, W3), out3.shape
    assert out3.dtype == x3.dtype, out3.dtype
    assert jnp.array_equal(out3, ref3), "mismatch vs reference (case 3)"

    print("KERNEL_OK")
</pallas_src>

<mosaic_0001>
module attributes {stable_mosaic.version = 11 : i64} {
  func.func @_unembed_kernel(%arg0: i32, %arg1: i32, %arg2: memref<1x256x64xf32, #tpu.memory_space<vmem>>, %arg3: memref<1x64x256xf32, #tpu.memory_space<vmem>>) attributes {dimension_semantics = [#tpu.dimension_semantics<parallel>, #tpu.dimension_semantics<parallel>], iteration_bounds = array<i64: 2, 1>, scalar_prefetch = 0 : i64, scratch_operands = 0 : i64, tpu.core_type = #tpu.core_type<tc>, window_params = [{transform_indices = @transform_0, window_bounds = array<i64: 1, 256, 64>}, {transform_indices = @transform_1, window_bounds = array<i64: 1, 64, 256>}]} {
    %c0 = arith.constant 0 : index
    %c0_0 = arith.constant 0 : index
    %c0_1 = arith.constant 0 : index
    %0 = vector.load %arg2[%c0, %c0_0, %c0_1] : memref<1x256x64xf32, #tpu.memory_space<vmem>>, vector<1x256x64xf32>
    %1 = vector.shape_cast %0 : vector<1x256x64xf32> to vector<256x64xf32>
    %2 = tpu.transpose %1, [1, 0] : vector<256x64xf32> -> vector<64x256xf32>
    %c0_2 = arith.constant 0 : index
    %c0_3 = arith.constant 0 : index
    %c0_4 = arith.constant 0 : index
    %3 = vector.load %arg3[%c0_2, %c0_3, %c0_4] : memref<1x64x256xf32, #tpu.memory_space<vmem>>, vector<1x64x256xf32>
    %4 = vector.shape_cast %3 : vector<1x64x256xf32> to vector<64x256xf32>
    %5 = vector.shape_cast %2 : vector<64x256xf32> to vector<1x64x256xf32>
    tpu.vector_store %arg3[%c0_2, %c0_3, %c0_4], %5 {strides = array<i32>} : memref<1x64x256xf32, #tpu.memory_space<vmem>>, vector<1x64x256xf32>,
    return
  }
  func.func @transform_0(%arg0: i32, %arg1: i32) -> (i32, i32, i32) {
    %c0_i32 = arith.constant 0 : i32
    %c0_i32_0 = arith.constant 0 : i32
    return %arg0, %arg1, %c0_i32 : i32, i32, i32
  }
  func.func @transform_1(%arg0: i32, %arg1: i32) -> (i32, i32, i32) {
    %c0_i32 = arith.constant 0 : i32
    %c0_i32_0 = arith.constant 0 : i32
    return %arg0, %c0_i32, %arg1 : i32, i32, i32
  }
}

</mosaic_0001>

<bundles_post_ra>
// kernel: tpu_custom_call.1
= control target key start
LH: loop header
LB: loop body
LE: loop exit
PB: predicated region body
PF: predicated region fallthrough
CT: control target
= control target key end

     0   :  { %6 = vsyncpa [#allocation3], 0  ;;  %s690_s0 = inlined_call_operand.vmem [shape: f32[2,256,64], index: 0, kind: input, shape index: {}]   ;;  %s691_s1 = inlined_call_operand.hbm [shape: f32[2,64,256], index: 1, kind: output, shape index: {}]  }
   0x1   :  { %8 = vsyncpa [#allocation3 + $0x1], 0  ;;  %s518_s6 = smov 0   ;;  %s520_s7 = smov 0  }
   0x2   :  { %s522_s8 = smov 0   ;;  %s524_s9 = smov 0  }
   0x3   :  { %s526_s10 = smov 0   ;;  %s528_s11 = smov 0  }
   0x4 LB: > { %s353_s12 = sadd.s32 4294967295, %s503_s11   ;;  %s354_s13 = sadd.s32 4294967294, %s503_s11   ;;  %s503_s11 = sphi %s528_s11, %s14_s11   ;;  %s499_s10 = sphi %s526_s10, %s698_s10   ;;  %s495_s9 = sphi %s524_s9, %s697_s9   ;;  %s491_s8 = sphi %s522_s8, %s696_s8   ;;  %s487_s7 = sphi %s520_s7, %s695_s7   ;;  %s483_s6 = sphi %s518_s6, %s694_s6  }
   0x5   : > { %s26_s14 = sadd.s32 1, %s499_s10  ;;  %s63_s15 = sadd.s32 1, %s491_s8 }
   0x6   : > { %p28_p0 = scmp.ge.s32.totalorder %s26_s14, 2  ;;  %p73_p1 = scmp.ne.s32.totalorder %s491_s8, %s487_s7 }
   0x7   : > { %p74_p2 = scmp.eq.s32.totalorder %s353_s12, 1  ;;  %p79_p3 = scmp.ne.s32.totalorder %s487_s7, %s483_s6 }
   0x8   : > { %s700_s14 = smov (%p28_p0, %s26_s14), 0  ;;  %p80_p5 = scmp.eq.s32.totalorder %s354_s13, 1 }
   0x9   : > { %p558_p4 = por %p74_p2, %p73_p1  ;;  %s58_s17 = ssub.s32 %s499_s10, %s700_s14 }
   0xa   : > { %p357_p6 = scmp.ge.s32.totalorder %s503_s11, 1  ;;  %p61_p7 = scmp.eq.s32.totalorder %s58_s17, 0 }
   0xb   : > { %p565_p8 = por %p80_p5, %p79_p3  ;;  %p111_p9 = scmp.lt.s32.totalorder %s503_s11, 3 }
   0xc   : > { %s571_s19 = scalar_select %p61_p7, %s491_s8, %s63_s15  }
   0xd   : > { %p112_p10 = pnand %p357_p6, %p111_p9 }
   0xe   : > { %p136_p11 = scmp.lt.s32.totalorder (!%p112_p10), %s495_s9, 1  ;;  %s132_s25 = sand.u32 (!%p112_p10), 1, %s487_s7  }
   0xf   : > { %115 = sbr.rel (%p112_p10) target bundleno = 200 (0xc8), region = 24  ;;  %s358_s26 = sshll.u32 (!%p112_p10), %s132_s25, 7 }
  0x10   : > { %s615_s27 = scalar_lea.vmem (!%p112_p10), [#allocation2], %s358_s26  ;;  %s367_s28 = sshll.u32 (!%p112_p10), %s495_s9, 11 }
  0x11   : > { %s274_s29 = sshll.u32 (!%p112_p10), %s615_s27, 4  ;;  %s636_s3 = scalar_lea.hbm (!%p112_p10), %s691_s1, %s367_s28  ;;  %s638_s29 = int_to_ptr.vmem [resolvable:$true] %s274_s29 }
  0x12   : > { %s644_s4 = scalar_lea.sflag (!%p112_p10), [#allocation3], %s132_s25  ;;  %s425_s5 = scalar_lea.vmem (!%p112_p10), %s638_s29, 2048 }
  0x13   : > { %p426_p12 = scmp.ne.s32.totalorder (!%p112_p10), %s638_s29, %s425_s5 }
  0x15   : > { %p427_p13 = pnand (!%p112_p10), %p426_p12, %p558_p4 }
  0x16   : > { %s137_s20 = scalar_select %p136_p11, %s495_s9, 1 }
  0x17   : > { %p428_p0 = pneg %p427_p13  ;;  %s505_s9 = smov [#allocation2]  }
  0x18   : > { %s366_s21 = sshll.u32 %s137_s20, 8  ;;  %s429_s12 = sshll.u32 %s505_s9, 4  ;;  %s430_s12 = int_to_ptr.vmem [resolvable:$false] %s429_s12 }
  0x19   : > { %s578_s24 = scalar_lea.vmem %s690_s0, %s366_s21  ;;  %s431_s13 = scalar_lea.vmem %s430_s12, 4096 }
  0x1a   : > { %v162_v0 = vld [vmem:[%s578_s24 + $0x80] sm:$0xff]  ;;  %v163_v2 = vld [vmem:[%s578_s24 + $0x88] sm:$0xff]  ;;  %v164_v4 = vld [vmem:[%s578_s24 + $0x90] sm:$0xff]  ;;  %p432_p1 = scmp.lt.s32.totalorder %s638_s29, %s430_s12  ;;  %p433_p2 = scmp.lt.s32.totalorder %s431_s13, %s425_s5 }
  0x1b   : > { %v146_v1 = vld [vmem:[%s578_s24] sm:$0xff]  ;;  %210 = vxpose.xlu1.b32.start [1/16] (narrow) %v162_v0, 64  ;;  %v147_v3 = vld [vmem:[%s578_s24 + $0x8] sm:$0xff]  ;;  %v148_v5 = vld [vmem:[%s578_s24 + $0x10] sm:$0xff] }
  0x1c   : > { %178 = vxpose.xlu0.b32.start [1/16] (narrow) %v146_v1, 64  ;;  %v165_v6 = vld [vmem:[%s578_s24 + $0x98] sm:$0xff]  ;;  %v166_v8 = vld [vmem:[%s578_s24 + $0xa0] sm:$0xff]  ;;  %v167_v10 = vld [vmem:[%s578_s24 + $0xa8] sm:$0xff]  ;;  %p434_p3 = por %p433_p2, %p432_p1 }
  0x1d   : > { %v149_v7 = vld [vmem:[%s578_s24 + $0x18] sm:$0xff]  ;;  %v150_v9 = vld [vmem:[%s578_s24 + $0x20] sm:$0xff]  ;;  %v151_v11 = vld [vmem:[%s578_s24 + $0x28] sm:$0xff] }
  0x1e   : > { %v168_v12 = vld [vmem:[%s578_s24 + $0xb0] sm:$0xff]  ;;  %v169_v14 = vld [vmem:[%s578_s24 + $0xb8] sm:$0xff]  ;;  %v170_v16 = vld [vmem:[%s578_s24 + $0xc0] sm:$0xff]  ;;  %p435_p5 = pnand %p434_p3, %p428_p0 }
  0x1f   : > { %211 = vxpose.xlu1.b32.cont [2/16] (narrow) %v163_v2, 64  ;;  %v152_v13 = vld [vmem:[%s578_s24 + $0x30] sm:$0xff]  ;;  %v153_v15 = vld [vmem:[%s578_s24 + $0x38] sm:$0xff]  ;;  %v154_v17 = vld [vmem:[%s578_s24 + $0x40] sm:$0xff] }
  0x20   : > { %179 = vxpose.xlu0.b32.cont [2/16] (narrow) %v147_v3, 64  ;;  %v171_v18 = vld [vmem:[%s578_s24 + $0xc8] sm:$0xff]  ;;  %v172_v20 = vld [vmem:[%s578_s24 + $0xd0] sm:$0xff]  ;;  %v173_v22 = vld [vmem:[%s578_s24 + $0xd8] sm:$0xff] }
  0x21   : > { %v155_v19 = vld [vmem:[%s578_s24 + $0x48] sm:$0xff]  ;;  %v156_v21 = vld [vmem:[%s578_s24 + $0x50] sm:$0xff]  ;;  %v157_v23 = vld [vmem:[%s578_s24 + $0x58] sm:$0xff] }
  0x22   : > { %v174_v24 = vld [vmem:[%s578_s24 + $0xe0] sm:$0xff]  ;;  %v175_v26 = vld [vmem:[%s578_s24 + $0xe8] sm:$0xff]  ;;  %v176_v28 = vld [vmem:[%s578_s24 + $0xf0] sm:$0xff] }
  0x23   : > { %212 = vxpose.xlu1.b32.cont [3/16] (narrow) %v164_v4, 64  ;;  %v158_v25 = vld [vmem:[%s578_s24 + $0x60] sm:$0xff]  ;;  %v159_v27 = vld [vmem:[%s578_s24 + $0x68] sm:$0xff]  ;;  %v160_v29 = vld [vmem:[%s578_s24 + $0x70] sm:$0xff] }
  0x24   : > { %180 = vxpose.xlu0.b32.cont [3/16] (narrow) %v148_v5, 64  ;;  %v177_v30 = vld [vmem:[%s578_s24 + $0xf8] sm:$0xff] }
  0x25   : > { %v161_v31 = vld [vmem:[%s578_s24 + $0x78] sm:$0xff] }
  0x27   : > { %213 = vxpose.xlu1.b32.cont [4/16] (narrow) %v165_v6, 64 }
  0x28   : > { %181 = vxpose.xlu0.b32.cont [4/16] (narrow) %v149_v7, 64 }
  0x2b   : > { %214 = vxpose.xlu1.b32.cont [5/16] (narrow) %v166_v8, 64 }
  0x2c   : > { %182 = vxpose.xlu0.b32.cont [5/16] (narrow) %v150_v9, 64 }
  0x2f   : > { %215 = vxpose.xlu1.b32.cont [6/16] (narrow) %v167_v10, 64 }
  0x30   : > { %183 = vxpose.xlu0.b32.cont [6/16] (narrow) %v151_v11, 64 }
  0x33   : > { %216 = vxpose.xlu1.b32.cont [7/16] (narrow) %v168_v12, 64 }
  0x34   : > { %184 = vxpose.xlu0.b32.cont [7/16] (narrow) %v152_v13, 64 }
  0x37   : > { %217 = vxpose.xlu1.b32.cont [8/16] (narrow) %v169_v14, 64 }
  0x38   : > { %185 = vxpose.xlu0.b32.cont [8/16] (narrow) %v153_v15, 64 }
  0x3b   : > { %218 = vxpose.xlu1.b32.cont [9/16] (narrow) %v170_v16, 64 }
  0x3c   : > { %186 = vxpose.xlu0.b32.cont [9/16] (narrow) %v154_v17, 64 }
  0x3f   : > { %219 = vxpose.xlu1.b32.cont [10/16] (narrow) %v171_v18, 64 }
  0x40   : > { %187 = vxpose.xlu0.b32.cont [10/16] (narrow) %v155_v19, 64 }
  0x43   : > { %220 = vxpose.xlu1.b32.cont [11/16] (narrow) %v172_v20, 64 }
  0x44   : > { %188 = vxpose.xlu0.b32.cont [11/16] (narrow) %v156_v21, 64 }
  0x47   : > { %221 = vxpose.xlu1.b32.cont [12/16] (narrow) %v173_v22, 64 }
  0x48   : > { %189 = vxpose.xlu0.b32.cont [12/16] (narrow) %v157_v23, 64 }
  0x4b   : > { %222 = vxpose.xlu1.b32.cont [13/16] (narrow) %v174_v24, 64 }
  0x4c   : > { %190 = vxpose.xlu0.b32.cont [13/16] (narrow) %v158_v25, 64 }
  0x4f   : > { %223 = vxpose.xlu1.b32.cont [14/16] (narrow) %v175_v26, 64 }
  0x50   : > { %191 = vxpose.xlu0.b32.cont [14/16] (narrow) %v159_v27, 64 }
  0x53   : > { %224 = vxpose.xlu1.b32.cont [15/16] (narrow) %v176_v28, 64 }
  0x54   : > { %192 = vxpose.xlu0.b32.cont [15/16] (narrow) %v160_v29, 64 }
  0x57   : > { %225 = vxpose.xlu1.b32.end [16/16] (narrow) %v177_v30, 64 }
  0x58   : > { %193 = vxpose.xlu0.b32.end [16/16] (narrow) %v161_v31, 64 }
  0x9b   : > { %v226_v32 = vpop.trf.xlu1 }
  0x9c   : > { %v194_v33 = vpop.trf.xlu0  ;;  %243 = vst [vmem:[%s615_s27 + $0x8] sm:$0xff] %v226_v32 }
  0x9d   : > { %242 = vst [vmem:[%s615_s27] sm:$0xff] %v194_v33 }
  0x9f   : > { %v227_v34 = vpop.trf.xlu1 }
  0xa0   : > { %v195_v35 = vpop.trf.xlu0  ;;  %245 = vst [vmem:[%s615_s27 + $0x18] sm:$0xff] %v227_v34 }
  0xa1   : > { %244 = vst [vmem:[%s615_s27 + $0x10] sm:$0xff] %v195_v35 }
  0xa3   : > { %v228_v36 = vpop.trf.xlu1 }
  0xa4   : > { %v196_v37 = vpop.trf.xlu0  ;;  %247 = vst [vmem:[%s615_s27 + $0x28] sm:$0xff] %v228_v36 }
  0xa5   : > { %246 = vst [vmem:[%s615_s27 + $0x20] sm:$0xff] %v196_v37 }
  0xa7   : > { %v229_v38 = vpop.trf.xlu1 }
  0xa8   : > { %v197_v39 = vpop.trf.xlu0  ;;  %249 = vst [vmem:[%s615_s27 + $0x38] sm:$0xff] %v229_v38 }
  0xa9   : > { %248 = vst [vmem:[%s615_s27 + $0x30] sm:$0xff] %v197_v39 }
  0xab   : > { %v230_v40 = vpop.trf.xlu1 }
  0xac   : > { %v198_v41 = vpop.trf.xlu0  ;;  %251 = vst [vmem:[%s615_s27 + $0x48] sm:$0xff] %v230_v40 }
  0xad   : > { %250 = vst [vmem:[%s615_s27 + $0x40] sm:$0xff] %v198_v41 }
  0xaf   : > { %v231_v42 = vpop.trf.xlu1 }
  0xb0   : > { %v199_v43 = vpop.trf.xlu0  ;;  %253 = vst [vmem:[%s615_s27 + $0x58] sm:$0xff] %v231_v42 }
  0xb1   : > { %252 = vst [vmem:[%s615_s27 + $0x50] sm:$0xff] %v199_v43 }
  0xb3   : > { %v232_v44 = vpop.trf.xlu1 }
  0xb4   : > { %v200_v45 = vpop.trf.xlu0  ;;  %255 = vst [vmem:[%s615_s27 + $0x68] sm:$0xff] %v232_v44 }
  0xb5   : > { %254 = vst [vmem:[%s615_s27 + $0x60] sm:$0xff] %v200_v45 }
  0xb7   : > { %v233_v46 = vpop.trf.xlu1 }
  0xb8   : > { %v201_v47 = vpop.trf.xlu0  ;;  %257 = vst [vmem:[%s615_s27 + $0x78] sm:$0xff] %v233_v46 }
  0xb9   : > { %256 = vst [vmem:[%s615_s27 + $0x70] sm:$0xff] %v201_v47 }
  0xba   : > { %438 = shalt.err (!%p435_p5)
}
  0xbb   : > { %s439_s15 = scalar_lea.hbm %s636_s3, 2048  ;;  %s443_s21 = scalar_lea.hbm %s691_s1, 4096 }
  0xbc   : > { %p440_p6 = scmp.ne.s32.totalorder %s636_s3, %s439_s15  ;;  %p444_p10 = scmp.lt.u32.totalorder %s636_s3, %s691_s1 }
  0xbd   : > { %p445_p11 = scmp.lt.u32.totalorder %s443_s21, %s439_s15  ;;  %p447_p13 = scmp.lt.u32.totalorder %s439_s15, %s636_s3 }
  0xbe   : > { %p441_p7 = pnand %p440_p6, %p558_p4 }
  0xbf   : > { %p446_p12 = por %p445_p11, %p444_p10 }
  0xc0   : > { %p442_p9 = pneg %p441_p7 }
  0xc1   : > { %p448_p0 = por %p447_p13, %p446_p12 }
  0xc3   : > { %p449_p1 = pnand %p448_p0, %p442_p9 }
  0xc5   : > { %452 = shalt.err (!%p449_p1)
}
  0xc6   : > { %s506_s24 = smov 256   ;;  %s507_s25 = smov 16  }
  0xc7   : > { %368 = dma.vmem_to_hbm [thread:$0]  (%p558_p4), %s638_s29, 2048, %s636_s3, %s644_s4, %s506_s24, %s506_s24, %s507_s25  }
  0xc8 PF: > { %p374_p2 = scmp.ge.s32.totalorder %s503_s11, 2  ;;  %s289_s26 = sand.u32 1, %s483_s6  }
  0xc9   : > { %s290_s27 = scalar_lea.sflag [#allocation3], %s289_s26 }
  0xca   : > { %p371_p3 = pnand %p374_p2, %p565_p8 }
  0xcc   : > { %478 = dma.done.wait (!%p371_p3), %s290_s27, 2048  }
  0xcd   : > { %480 = vsyncadd (!%p371_p3), %s290_s27, 4294965248  ;;  %s14_s11 = sadd.s32 1, %s503_s11   ;;  %s694_s6 = smov %s487_s7 }
  0xce   : > { %p11_p5 = scmp.ge.s32.totalorder %s14_s11, 4   ;;  %s695_s7 = smov %s491_s8 }
  0xcf   : > { %s696_s8 = smov %s571_s19  ;;  %s697_s9 = smov %s499_s10 }
  0xd0   : > { %s698_s10 = smov %s700_s14  ;;  %13 = sbr.rel (!%p11_p5) target bundleno = 4 (0x4), region = 59 }
  0xd7   :  { %295 = vsyncpa [#allocation3], 1 }
  0xd8   :  { %297 = vsyncpa [#allocation3 + $0x1], 1 }

</bundles_post_ra>
